<compile_context>
chip_gen: v6e
topology: v6e:2x2x1
jax: 0.10.0
libtpu: 0.0.40
codegen_flags: <defaults>
</compile_context>

<pallas_src>
import functools
import math

import jax
import jax.numpy as jnp
from jax.experimental import pallas as pl
from jax.experimental.pallas import tpu as pltpu


_EPS = 1e-9
_LOG_EPS = math.log(_EPS)                 # log(1e-9)
_LOG_ONE_MINUS_EPS = math.log(1.0 - _EPS)  # log(1 - 1e-9)


def _focal_loss_kernel(x_ref, t_ref, loss_ref, cnt_ref, *,
                       gamma, ignore_label, num_classes,
                       hw, tile, tiles_per_core):
    """One (pixel tile, batch image) step of the focal loss.

    x_ref    : (C, TILE)  logits (classes on sublanes, pixels on lanes)
    t_ref    : (1, TILE)  int32 targets
    loss_ref : (1, TILE)  f32 per-lane loss accumulator   (grid-resident out)
    cnt_ref  : (1, TILE)  f32 per-lane valid-count accum  (grid-resident out)
    """
    c_id = pl.program_id(0)   # core split of the pixel-tile range ("parallel")
    n_id = pl.program_id(1)   # batch image                         ("arbitrary")
    i_id = pl.program_id(2)   # pixel tile within this core's range ("arbitrary")

    # Zero this core's per-lane accumulators on its first step.
    @pl.when(jnp.logical_and(n_id == 0, i_id == 0))
    def _():
        loss_ref[...] = jnp.zeros_like(loss_ref)
        cnt_ref[...] = jnp.zeros_like(cnt_ref)

    x = x_ref[...].astype(jnp.float32)       # (C, TILE), math in f32
    t = t_ref[...]                           # (1, TILE) int32

    # Lane validity: the ragged tail (and any clamped/duplicated overhang tile
    # on the last core) is masked by the global pixel index -- no host-side
    # padding copy of the logits is ever made.
    pix_base = (c_id * tiles_per_core + i_id) * tile
    lane = jax.lax.broadcasted_iota(jnp.int32, t.shape, 1)
    in_range = (pix_base + lane) < hw

    valid = jnp.logical_and(in_range,
                            jnp.logical_and(t >= 0, t != ignore_label))

    # Gather the target-class logit with a one-hot reduce (no dynamic gather);
    # clamp the index like the pure-JAX reference so out-of-range labels are
    # finite (they are masked anyway if they equal ignore_label / < 0).
    t_c = jnp.clip(t, 0, num_classes - 1)
    cls = jax.lax.broadcasted_iota(jnp.int32, x.shape, 0)
    x_t = jnp.sum(jnp.where(cls == t_c, x, 0.0), axis=0, keepdims=True)

    # log p_t = x_t - logsumexp(x): no C-wide divide / clip.
    m = jnp.max(x, axis=0, keepdims=True)
    lse = m + jnp.log(jnp.sum(jnp.exp(x - m), axis=0, keepdims=True))
    log_p = x_t - lse
    # Probability clamp to [1e-9, 1-1e-9] (log is monotone -> clamp log p).
    log_p = jnp.clip(log_p, _LOG_EPS, _LOG_ONE_MINUS_EPS)
    p_t = jnp.exp(log_p)

    q = 1.0 - p_t
    if float(gamma).is_integer():
        focal = q ** int(gamma)              # integer_pow -> repeated multiplies
    else:
        focal = q ** jnp.float32(gamma)      # falls back to exp/log on EUP
    loss = jnp.where(valid, -focal * log_p, 0.0)

    loss_ref[...] += loss
    cnt_ref[...] += valid.astype(jnp.float32)


def _round_down(v, m):
    return (v // m) * m


def _pick_tile(num_classes, hw, x_itemsize, vmem_cap):
    # VMEM bytes per lane: double-buffered (C, tile) logits block +
    # double-buffered (1, tile) int32 target block + two resident f32 outputs.
    per_lane = 2 * (num_classes * x_itemsize + 4) + 2 * 4
    budget = vmem_cap // 8                   # generous headroom
    tile = min(8192, max(128, budget // per_lane))
    if hw >= 128:
        tile = min(tile, hw)
        tile = max(128, _round_down(tile, 128))
    else:
        tile = hw                            # short pixel axis: full extent
    return tile, per_lane


def focal_loss_2d(predict, target, *, gamma=2, size_average=True,
                  ignore_label=255, tile=None, num_cores=2):
    """predict: (N, C, H, W) float (f32 or bf16), target: (N, H, W) int."""
    N, C, H, W = predict.shape
    hw = H * W

    # Free reshapes only -- no HBM transpose, no padding copy of the logits.
    x = predict.reshape(N, C, hw)
    t = target.reshape(N, 1, hw).astype(jnp.int32)

    try:
        vmem_cap = int(pltpu.get_tpu_info().vmem_capacity_bytes)
    except Exception:
        vmem_cap = 64 * 1024 * 1024          # conservative (v7x per-core)

    itemsize = jnp.dtype(predict.dtype).itemsize
    auto_tile, per_lane = _pick_tile(C, hw, itemsize, vmem_cap)
    if tile is None:
        tile = auto_tile

    n_tiles = pl.cdiv(hw, tile)
    num_cores = max(1, min(num_cores, n_tiles))
    tiles_per_core = pl.cdiv(n_tiles, num_cores)

    def pixel_block(c, i):
        # Clamp so an overhang tile on the last core never yields an
        # out-of-range block index; its lanes are masked out in-kernel.
        return jnp.minimum(c * tiles_per_core + i, n_tiles - 1)

    kernel = functools.partial(
        _focal_loss_kernel,
        gamma=gamma, ignore_label=ignore_label, num_classes=C,
        hw=hw, tile=tile, tiles_per_core=tiles_per_core)

    needed = per_lane * tile
    cp_kwargs = dict(dimension_semantics=("parallel", "arbitrary", "arbitrary"))
    if 2 * needed > (16 << 20):
        # Only raise the scoped-VMEM limit when the working set needs it;
        # cap at half the physical VMEM (v7x has only 64 MiB per core).
        cp_kwargs["vmem_limit_bytes"] = int(min(3 * needed, vmem_cap // 2))

    loss_lanes, cnt_lanes = pl.pallas_call(
        kernel,
        out_shape=(jax.ShapeDtypeStruct((num_cores, 1, tile), jnp.float32),
                   jax.ShapeDtypeStruct((num_cores, 1, tile), jnp.float32)),
        grid_spec=pltpu.PrefetchScalarGridSpec(
            num_scalar_prefetch=0,
            grid=(num_cores, N, tiles_per_core),
            in_specs=[
                pl.BlockSpec((None, C, tile),
                             lambda c, n, i: (n, 0, pixel_block(c, i))),
                pl.BlockSpec((None, 1, tile),
                             lambda c, n, i: (n, 0, pixel_block(c, i))),
            ],
            out_specs=(
                pl.BlockSpec((None, 1, tile), lambda c, n, i: (c, 0, 0)),
                pl.BlockSpec((None, 1, tile), lambda c, n, i: (c, 0, 0)),
            ),
        ),
        compiler_params=pltpu.CompilerParams(**cp_kwargs),
    )(x, t)

    loss_sum = jnp.sum(loss_lanes)
    valid_cnt = jnp.sum(cnt_lanes)
    if size_average:
        # NOTE: if every pixel is ignored this divides by zero (NaN), which
        # matches the reference's .mean() over an empty selection.
        return loss_sum / valid_cnt
    return loss_sum


class CrossEntropy2d:
    """JAX/Pallas port of the PyTorch CrossEntropy2d (focal loss) module."""

    def __init__(self, class_num, alpha=None, gamma=2, size_average=True,
                 ignore_label=255):
        if alpha is None:
            # (class_num, 1) of ones; unused in forward (as in the reference).
            self.alpha = jnp.ones((class_num, 1), jnp.float32)
        else:
            self.alpha = jnp.asarray(alpha)
        self.gamma = gamma
        self.class_num = class_num
        self.size_average = size_average
        self.ignore_label = ignore_label

    def __call__(self, predict, target):
        return focal_loss_2d(predict, target,
                             gamma=self.gamma,
                             size_average=self.size_average,
                             ignore_label=self.ignore_label)


def _reference_focal(predict, target, gamma, ignore_label, size_average):
    """Pure-JAX reference (matches the PyTorch module for N == 1)."""
    N, C, H, W = predict.shape
    P = jax.nn.softmax(predict.astype(jnp.float32), axis=1)
    P = jnp.clip(P, 1e-9, 1.0 - 1e-9)
    valid = (target >= 0) & (target != ignore_label)
    t_safe = jnp.clip(target, 0, C - 1)
    p_t = jnp.take_along_axis(P, t_safe[:, None, :, :], axis=1)[:, 0]
    loss = -((1.0 - p_t) ** gamma) * jnp.log(p_t)
    loss = jnp.where(valid, loss, 0.0)
    if size_average:
        return loss.sum() / valid.sum()
    return loss.sum()


if __name__ == "__main__":
    key = jax.random.PRNGKey(0)

    # Case 1: N=2, C=4, 16x20 -- exercises the batch grid axis, the 2-way core
    # split (2 pixel tiles of 256 over 320 pixels) and the ragged-tail mask.
    N, C, H, W = 2, 4, 16, 20
    k1, k2, k3, k4 = jax.random.split(key, 4)
    predict = jax.random.normal(k1, (N, C, H, W), jnp.float32)
    target = jax.random.randint(k2, (N, H, W), 0, C, jnp.int32)
    ignore_mask = jax.random.bernoulli(k3, 0.1, (N, H, W))
    target = jnp.where(ignore_mask, 255, target)

    module = CrossEntropy2d(class_num=C, gamma=2, size_average=True,
                            ignore_label=255)
    loss = jax.block_until_ready(module(predict, target))
    ref = _reference_focal(predict, target, gamma=2, ignore_label=255,
                           size_average=True)
    assert jnp.allclose(loss, ref, rtol=2e-5, atol=2e-6), (loss, ref)

    # Case 2: N=1, C=4, 16x16 -- the case where the PyTorch reference forward
    # is exactly well-defined; also test size_average=False (sum).
    predict1 = jax.random.normal(k4, (1, C, 16, 16), jnp.float32)
    target1 = jax.random.randint(k2, (1, 16, 16), 0, C, jnp.int32)
    loss1 = jax.block_until_ready(
        focal_loss_2d(predict1, target1, gamma=2, size_average=False,
                      ignore_label=255))
    ref1 = _reference_focal(predict1, target1, gamma=2, ignore_label=255,
                            size_average=False)
    assert jnp.allclose(loss1, ref1, rtol=2e-5, atol=2e-5), (loss1, ref1)

    print("KERNEL_OK")
</pallas_src>

<mosaic_0001>
module attributes {stable_mosaic.version = 11 : i64} {
  func.func @_focal_loss_kernel(%arg0: i32, %arg1: i32, %arg2: i32, %arg3: memref<1x4x256xf32, #tpu.memory_space<vmem>>, %arg4: memref<1x1x256xi32, #tpu.memory_space<vmem>>, %arg5: memref<1x1x256xf32, #tpu.memory_space<vmem>>, %arg6: memref<1x1x256xf32, #tpu.memory_space<vmem>>) attributes {dimension_semantics = [#tpu.dimension_semantics<parallel>, #tpu.dimension_semantics<arbitrary>, #tpu.dimension_semantics<arbitrary>], iteration_bounds = array<i64: 2, 2, 1>, scalar_prefetch = 0 : i64, scratch_operands = 0 : i64, tpu.core_type = #tpu.core_type<tc>, window_params = [{transform_indices = @transform_0, window_bounds = array<i64: 1, 4, 256>}, {transform_indices = @transform_1, window_bounds = array<i64: 1, 1, 256>}, {transform_indices = @transform_2, window_bounds = array<i64: 1, 1, 256>}, {transform_indices = @transform_3, window_bounds = array<i64: 1, 1, 256>}]} {
    %c0_i32 = arith.constant 0 : i32
    %0 = arith.cmpi eq, %arg1, %c0_i32 : i32
    %c0_i32_0 = arith.constant 0 : i32
    %1 = arith.cmpi eq, %arg2, %c0_i32_0 : i32
    %2 = arith.andi %0, %1 : i1
    %3 = arith.extui %2 : i1 to i32
    %c0_i32_1 = arith.constant 0 : i32
    %4 = arith.cmpi ne, %3, %c0_i32_1 : i32
    scf.if %4 {
      %cst_29 = arith.constant 0.000000e+00 : f32
      %71 = vector.broadcast %cst_29 : f32 to vector<1x256xf32>
      %c0_30 = arith.constant 0 : index
      %c0_31 = arith.constant 0 : index
      %c0_32 = arith.constant 0 : index
      %72 = vector.load %arg5[%c0_30, %c0_31, %c0_32] : memref<1x1x256xf32, #tpu.memory_space<vmem>>, vector<1x1x256xf32>
      %73 = vector.shape_cast %72 : vector<1x1x256xf32> to vector<1x256xf32>
      %74 = vector.shape_cast %71 : vector<1x256xf32> to vector<1x1x256xf32>
      tpu.vector_store %arg5[%c0_30, %c0_31, %c0_32], %74 {strides = array<i32>} : memref<1x1x256xf32, #tpu.memory_space<vmem>>, vector<1x1x256xf32>,
      %cst_33 = arith.constant 0.000000e+00 : f32
      %75 = vector.broadcast %cst_33 : f32 to vector<1x256xf32>
      %c0_34 = arith.constant 0 : index
      %c0_35 = arith.constant 0 : index
      %c0_36 = arith.constant 0 : index
      %76 = vector.load %arg6[%c0_34, %c0_35, %c0_36] : memref<1x1x256xf32, #tpu.memory_space<vmem>>, vector<1x1x256xf32>
      %77 = vector.shape_cast %76 : vector<1x1x256xf32> to vector<1x256xf32>
      %78 = vector.shape_cast %75 : vector<1x256xf32> to vector<1x1x256xf32>
      tpu.vector_store %arg6[%c0_34, %c0_35, %c0_36], %78 {strides = array<i32>} : memref<1x1x256xf32, #tpu.memory_space<vmem>>, vector<1x1x256xf32>,
    } else {
    }
    %c0 = arith.constant 0 : index
    %c0_2 = arith.constant 0 : index
    %c0_3 = arith.constant 0 : index
    %5 = vector.load %arg3[%c0, %c0_2, %c0_3] : memref<1x4x256xf32, #tpu.memory_space<vmem>>, vector<1x4x256xf32>
    %6 = vector.shape_cast %5 : vector<1x4x256xf32> to vector<4x256xf32>
    %c0_4 = arith.constant 0 : index
    %c0_5 = arith.constant 0 : index
    %c0_6 = arith.constant 0 : index
    %7 = vector.load %arg4[%c0_4, %c0_5, %c0_6] : memref<1x1x256xi32, #tpu.memory_space<vmem>>, vector<1x1x256xi32>
    %8 = vector.shape_cast %7 : vector<1x1x256xi32> to vector<1x256xi32>
    %c1_i32 = arith.constant 1 : i32
    %9 = arith.muli %arg0, %c1_i32 : i32
    %10 = arith.addi %9, %arg2 : i32
    %c256_i32 = arith.constant 256 : i32
    %11 = arith.muli %10, %c256_i32 : i32
    %12 = tpu.iota {dimensions = array<i32: 1>} : vector<1x256xi32>
    %13 = vector.broadcast %11 : i32 to vector<1x256xi32>
    %14 = arith.addi %13, %12 : vector<1x256xi32>
    %c320_i32 = arith.constant 320 : i32
    %15 = vector.broadcast %c320_i32 : i32 to vector<1x256xi32>
    %16 = arith.cmpi slt, %14, %15 : vector<1x256xi32>
    %c0_i32_7 = arith.constant 0 : i32
    %17 = vector.broadcast %c0_i32_7 : i32 to vector<1x256xi32>
    %18 = arith.cmpi sge, %8, %17 : vector<1x256xi32>
    %c255_i32 = arith.constant 255 : i32
    %19 = vector.broadcast %c255_i32 : i32 to vector<1x256xi32>
    %20 = arith.cmpi ne, %8, %19 : vector<1x256xi32>
    %21 = arith.andi %18, %20 : vector<1x256xi1>
    %22 = arith.andi %16, %21 : vector<1x256xi1>
    %c0_i32_8 = arith.constant 0 : i32
    %c3_i32 = arith.constant 3 : i32
    %23 = vector.broadcast %c0_i32_8 : i32 to vector<1x256xi32>
    %24 = arith.maxsi %23, %8 : vector<1x256xi32>
    %25 = vector.broadcast %c3_i32 : i32 to vector<1x256xi32>
    %26 = arith.minsi %25, %24 : vector<1x256xi32>
    %27 = tpu.iota {dimensions = array<i32: 0>} : vector<4x256xi32>
    %28 = vector.broadcast %26 : vector<1x256xi32> to vector<4x256xi32>
    %29 = arith.cmpi eq, %27, %28 : vector<4x256xi32>
    %cst = arith.constant 0.000000e+00 : f32
    %30 = vector.broadcast %cst : f32 to vector<4x256xf32>
    %31 = arith.select %29, %6, %30 : vector<4x256xi1>, vector<4x256xf32>
    %cst_9 = arith.constant dense<0.000000e+00> : vector<256xf32>
    %32 = vector.multi_reduction <add>, %31, %cst_9 [0] : vector<4x256xf32> to vector<256xf32>
    %33 = vector.shape_cast %32 : vector<256xf32> to vector<1x256xf32>
    %cst_10 = arith.constant dense<0xFF800000> : vector<256xf32>
    %34 = vector.multi_reduction <maximumf>, %6, %cst_10 [0] : vector<4x256xf32> to vector<256xf32>
    %35 = vector.shape_cast %34 : vector<256xf32> to vector<1x256xf32>
    %36 = vector.broadcast %35 : vector<1x256xf32> to vector<4x256xf32>
    %37 = arith.subf %6, %36 : vector<4x256xf32>
    %38 = math.exp %37 : vector<4x256xf32>
    %cst_11 = arith.constant dense<0.000000e+00> : vector<256xf32>
    %39 = vector.multi_reduction <add>, %38, %cst_11 [0] : vector<4x256xf32> to vector<256xf32>
    %40 = vector.shape_cast %39 : vector<256xf32> to vector<1x256xf32>
    %41 = math.log %40 : vector<1x256xf32>
    %42 = arith.addf %35, %41 : vector<1x256xf32>
    %43 = arith.subf %33, %42 : vector<1x256xf32>
    %cst_12 = arith.constant -20.7232666 : f32
    %cst_13 = arith.constant -9.99999971E-10 : f32
    %44 = vector.broadcast %cst_12 : f32 to vector<1x256xf32>
    %45 = arith.maximumf %44, %43 : vector<1x256xf32>
    %46 = vector.broadcast %cst_13 : f32 to vector<1x256xf32>
    %47 = arith.minimumf %46, %45 : vector<1x256xf32>
    %48 = math.exp %47 : vector<1x256xf32>
    %cst_14 = arith.constant 1.000000e+00 : f32
    %49 = vector.broadcast %cst_14 : f32 to vector<1x256xf32>
    %50 = arith.subf %49, %48 : vector<1x256xf32>
    %51 = arith.mulf %50, %50 : vector<1x256xf32>
    %cst_15 = arith.constant 0.000000e+00 : f32
    %52 = vector.broadcast %cst_15 : f32 to vector<1x256xf32>
    %53 = arith.subf %52, %51 : vector<1x256xf32>
    %54 = arith.mulf %53, %47 : vector<1x256xf32>
    %cst_16 = arith.constant 0.000000e+00 : f32
    %55 = vector.broadcast %cst_16 : f32 to vector<1x256xf32>
    %56 = arith.select %22, %54, %55 : vector<1x256xi1>, vector<1x256xf32>
    %c0_17 = arith.constant 0 : index
    %c0_18 = arith.constant 0 : index
    %c0_19 = arith.constant 0 : index
    %57 = vector.load %arg5[%c0_17, %c0_18, %c0_19] : memref<1x1x256xf32, #tpu.memory_space<vmem>>, vector<1x1x256xf32>
    %58 = vector.shape_cast %57 : vector<1x1x256xf32> to vector<1x256xf32>
    %59 = arith.addf %58, %56 : vector<1x256xf32>
    %c0_20 = arith.constant 0 : index
    %c0_21 = arith.constant 0 : index
    %c0_22 = arith.constant 0 : index
    %60 = vector.load %arg5[%c0_20, %c0_21, %c0_22] : memref<1x1x256xf32, #tpu.memory_space<vmem>>, vector<1x1x256xf32>
    %61 = vector.shape_cast %60 : vector<1x1x256xf32> to vector<1x256xf32>
    %62 = vector.shape_cast %59 : vector<1x256xf32> to vector<1x1x256xf32>
    tpu.vector_store %arg5[%c0_20, %c0_21, %c0_22], %62 {strides = array<i32>} : memref<1x1x256xf32, #tpu.memory_space<vmem>>, vector<1x1x256xf32>,
    %c0_23 = arith.constant 0 : index
    %c0_24 = arith.constant 0 : index
    %c0_25 = arith.constant 0 : index
    %63 = vector.load %arg6[%c0_23, %c0_24, %c0_25] : memref<1x1x256xf32, #tpu.memory_space<vmem>>, vector<1x1x256xf32>
    %64 = vector.shape_cast %63 : vector<1x1x256xf32> to vector<1x256xf32>
    %65 = arith.extui %22 : vector<1x256xi1> to vector<1x256xi32>
    %66 = arith.sitofp %65 : vector<1x256xi32> to vector<1x256xf32>
    %67 = arith.addf %64, %66 : vector<1x256xf32>
    %c0_26 = arith.constant 0 : index
    %c0_27 = arith.constant 0 : index
    %c0_28 = arith.constant 0 : index
    %68 = vector.load %arg6[%c0_26, %c0_27, %c0_28] : memref<1x1x256xf32, #tpu.memory_space<vmem>>, vector<1x1x256xf32>
    %69 = vector.shape_cast %68 : vector<1x1x256xf32> to vector<1x256xf32>
    %70 = vector.shape_cast %67 : vector<1x256xf32> to vector<1x1x256xf32>
    tpu.vector_store %arg6[%c0_26, %c0_27, %c0_28], %70 {strides = array<i32>} : memref<1x1x256xf32, #tpu.memory_space<vmem>>, vector<1x1x256xf32>,
    return
  }
  func.func @transform_0(%arg0: i32, %arg1: i32, %arg2: i32) -> (i32, i32, i32) {
    %c1_i32 = arith.constant 1 : i32
    %0 = arith.muli %arg0, %c1_i32 : i32
    %1 = arith.addi %0, %arg2 : i32
    %c1_i32_0 = arith.constant 1 : i32
    %2 = arith.minsi %1, %c1_i32_0 : i32
    %c0_i32 = arith.constant 0 : i32
    %c0_i32_1 = arith.constant 0 : i32
    return %arg1, %c0_i32, %2 : i32, i32, i32
  }
  func.func @transform_1(%arg0: i32, %arg1: i32, %arg2: i32) -> (i32, i32, i32) {
    %c1_i32 = arith.constant 1 : i32
    %0 = arith.muli %arg0, %c1_i32 : i32
    %1 = arith.addi %0, %arg2 : i32
    %c1_i32_0 = arith.constant 1 : i32
    %2 = arith.minsi %1, %c1_i32_0 : i32
    %c0_i32 = arith.constant 0 : i32
    %c0_i32_1 = arith.constant 0 : i32
    return %arg1, %c0_i32, %2 : i32, i32, i32
  }
  func.func @transform_2(%arg0: i32, %arg1: i32, %arg2: i32) -> (i32, i32, i32) {
    %c0_i32 = arith.constant 0 : i32
    %c0_i32_0 = arith.constant 0 : i32
    %c0_i32_1 = arith.constant 0 : i32
    return %arg0, %c0_i32, %c0_i32_0 : i32, i32, i32
  }
  func.func @transform_3(%arg0: i32, %arg1: i32, %arg2: i32) -> (i32, i32, i32) {
    %c0_i32 = arith.constant 0 : i32
    %c0_i32_0 = arith.constant 0 : i32
    %c0_i32_1 = arith.constant 0 : i32
    return %arg0, %c0_i32, %c0_i32_0 : i32, i32, i32
  }
}

</mosaic_0001>

<bundles_post_ra>
// kernel: tpu_custom_call.1
= control target key start
LH: loop header
LB: loop body
LE: loop exit
PB: predicated region body
PF: predicated region fallthrough
CT: control target
= control target key end

     0   :  { %9 = vsyncpa [#allocation3], 0  ;;  %s1425_s0 = inlined_call_operand.hbm [shape: f32[2,4,320], index: 0, kind: input, shape index: {}]   ;;  %s1426_s1 = inlined_call_operand.hbm [shape: s32[2,1,320], index: 1, kind: input, shape index: {}]   ;;  %s1427_s2 = inlined_call_operand.hbm [shape: f32[2,1,256], index: 2, kind: output, shape index: {0}]   ;;  %s1428_s3 = inlined_call_operand.hbm [shape: f32[2,1,256], index: 3, kind: output, shape index: {1}]  }
   0x1   :  { %11 = vsyncpa [#allocation3 + $0x1], 0 }
   0x2   :  { %12 = vsyncpa [#allocation6], 0 }
   0x3   :  { %14 = vsyncpa [#allocation6 + $0x1], 0 }
   0x4   :  { %15 = vsyncpa [#allocation4], 0 }
   0x5   :  { %17 = vsyncpa [#allocation4 + $0x1], 0 }
   0x6   :  { %18 = vsyncpa [#allocation9], 0 }
   0x7   :  { %20 = vsyncpa [#allocation9 + $0x1], 0  ;;  %s1068_s12 = smov 0   ;;  %s1070_s13 = smov 0  }
   0x8   :  { %s1072_s14 = smov 0   ;;  %s1074_s15 = smov 0  }
   0x9   :  { %s1076_s16 = smov 0   ;;  %s1078_s17 = smov 0  }
   0xa   :  { %s1080_s18 = smov 0   ;;  %s1082_s19 = smov 0  }
   0xb   :  { %s1084_s20 = smov 0   ;;  %s1086_s21 = smov 0  }
   0xc   :  { %s1088_s22 = smov 0  }
   0xd LB: > { %1434 = sst [smem:[#allocation14_spill]] %s1006_s14  ;;  %s677_s23 = sadd.s32 4294967295, %s1038_s22   ;;  %s1038_s22 = sphi %s1088_s22, %s26_s22   ;;  %s1034_s21 = sphi %s1086_s21, %s1458_s21   ;;  %s1030_s20 = sphi %s1084_s20, %s1465_s20   ;;  %s1026_s19 = sphi %s1082_s19, %s1456_s19   ;;  %s1022_s18 = sphi %s1080_s18, %s1464_s18   ;;  %s1018_s17 = sphi %s1078_s17, %s1463_s17   ;;  %s1014_s16 = sphi %s1076_s16, %s1462_s16   ;;  %s1010_s15 = sphi %s1074_s15, %s1461_s15   ;;  %s1006_s14 = sphi %s1072_s14, %s1454_s14   ;;  %s1002_s13 = sphi %s1070_s13, %s1460_s13   ;;  %s998_s12 = sphi %s1068_s12, %s1459_s12  }
   0xe   : > { %1435 = sst [smem:[#allocation15_spill]] %s1034_s21  ;;  %s678_s24 = sadd.s32 4294967294, %s1038_s22  }
   0xf   : > { %s41_s25 = sadd.s32 1, %s1030_s20  ;;  %s45_s26 = sadd.s32 1, %s1034_s21 }
  0x10   : > { %p43_p0 = scmp.ge.s32.totalorder %s41_s25, 2  ;;  %p50_p1 = scmp.lt.s32.totalorder %s1034_s21, 1 }
  0x11   : > { %s60_s27 = sadd.s32 1, %s1018_s17  ;;  %p67_p2 = scmp.ne.s32.totalorder %s1018_s17, %s1014_s16 }
  0x12   : > { %s1467_s25 = smov (%p43_p0, %s41_s25), 0  ;;  %s1469_s26 = smov (!%p43_p0, %s45_s26), %s1034_s21 }
  0x13   : > { %1436 = sst [smem:[#allocation16_spill]] %s1467_s25  ;;  %p47_p3 = scmp.ge.s32.totalorder %s1469_s26, 2 }
  0x14   : > { %s1133_s28 = scalar_select %p50_p1, %s1034_s21, 1 }
  0x15   : > { %s55_s29 = ssub.s32 %s1030_s20, %s1467_s25  ;;  %p68_p4 = scmp.eq.s32.totalorder %s1038_s22, 0 }
  0x16   : > { %p73_p5 = scmp.ne.s32.totalorder %s1014_s16, %s1010_s15  ;;  %s1471_s26 = smov (%p47_p3, %s1469_s26), 0 }
  0x17   : > { %1437 = sst [smem:[#allocation17_spill]] %s1471_s26  ;;  %p1141_p6 = por %p68_p4, %p67_p2 }
  0x18   : > { %p74_p7 = scmp.eq.s32.totalorder %s677_s23, 0  ;;  %p53_p8 = scmp.lt.s32.totalorder %s1471_s26, 1 }
  0x19   : > { %s117_s4 = ssub.s32 %s1034_s21, %s1471_s26  ;;  %s120_s7 = sadd.s32 1, %s1006_s14 }
  0x1a   : > { %p1148_p9 = por %p74_p7, %p73_p5  ;;  %p118_p10 = scmp.eq.s32.totalorder %s117_s4, 0 }
  0x1b   : > { %s54_s6 = scalar_select %p53_p8, %s1471_s26, 1 }
  0x1c   : > { %p130_p11 = scmp.ne.s32.totalorder %s1006_s14, %s1002_s13  ;;  %p131_p12 = scmp.eq.s32.totalorder %s677_s23, 3 }
  0x1d   : > { %s56_s8 = ssub.s32 %s1133_s28, %s54_s6  ;;  %p136_p13 = scmp.ne.s32.totalorder %s1002_s13, %s998_s12 }
  0x1e   : > { %s57_s9 = sor.u32 %s56_s8, %s55_s29  ;;  %p1159_p1 = por %p131_p12, %p130_p11 }
  0x1f   : > { %p58_p0 = scmp.eq.s32.totalorder %s57_s9, 0  ;;  %p137_p2 = scmp.eq.s32.totalorder %s678_s24, 3 }
  0x20   : > { %s1164_s11 = scalar_select %p118_p10, %s1006_s14, %s120_s7  }
  0x21   : > { %s1167_s15 = scalar_select %p58_p0, %s1018_s17, %s60_s27  }
  0x22   : > { %1441 = sst [smem:[#allocation18_spill]] %s1164_s11  ;;  %p1171_p3 = por %p137_p2, %p136_p13 }
  0x23   : > { %1442 = sst [smem:[#allocation19_spill]] %s1167_s15  ;;  %p680_p4 = scmp.ge.s32.totalorder %s1038_s22, 4 }
  0x24   : > { %s1443_s4 = scalar_select %p1171_p3, 1, 0 }
  0x25   : > { %179 = sbr.rel (%p680_p4) target bundleno = 110 (0x6e), region = 16 }
  0x26   : > { %1444 = sst [smem:[#allocation20_spill]] %s1443_s4 }
  0x2a   : > { %182 = sbr.rel (!%p1141_p6) target bundleno = 76 (0x4c), region = 20  ;;  %s183_s23 = sand.u32 (%p1141_p6), 1, %s1018_s17  }
  0x2b   : > { %s682_s29 = sshll.u32 (%p1141_p6), %s1133_s28, 1  ;;  %s681_s6 = sshll.u32 (%p1141_p6), %s183_s23, 3 }
  0x2c   : > { %s192_s7 = ssub.s32 (%p1141_p6), 3, %s682_s29  ;;  %s1183_s8 = scalar_lea.sflag (%p1141_p6), [#allocation3], %s183_s23 }
  0x2d   : > { %p193_p5 = scmp.lt.s32.totalorder (%p1141_p6), %s192_s7, 2  ;;  %s187_s9 = scalar_lea.vmem (%p1141_p6), [#allocation2], %s681_s6 }
  0x2f   : > { %s1473_s7 = smov (!%p193_p5, %s192_s7), 2 }
  0x30   : > { %s1180_s27 = sshll.u32 %s1473_s7, 6 }
  0x31   : > { %s197_s24 = ssub.s32 128, %s1180_s27 }
  0x32   : > { %198 = vsyncadd %s1183_s8, %s197_s24  ;;  %s713_s26 = smul.u32 3, %s1030_s20  ;;  %p684_p7 = scmp.ne.s32.totalorder %s1180_s27, 0 }
  0x33   : > { %s206_s25 = sshll.u32 %s187_s9, 4  ;;  %s836_s24 = scalar_lea.hbm %s1425_s0, 384  ;;  %s207_s25 = int_to_ptr.vmem [resolvable:$true] %s206_s25 }
  0x34   : > { %s201_s21 = sadd.s32 %s713_s26, %s682_s29 }
  0x35   : > { %s685_s15 = sshll.u32 %s201_s21, 6 }
  0x36   : > { %s203_s14 = scalar_lea.hbm %s1425_s0, %s685_s15 }
  0x37   : > { %s832_s4 = scalar_lea.hbm %s203_s14, %s1180_s27 }
  0x38   : > { %p833_p8 = scmp.ne.s32.totalorder %s203_s14, %s832_s4  ;;  %p838_p12 = scmp.lt.s32.totalorder %s836_s24, %s832_s4 }
  0x3a   : > { %p834_p10 = pnand %p833_p8, %p684_p7 }
  0x3c   : > { %p835_p11 = pneg %p834_p10 }
  0x3e   : > { %p840_p13 = pnand %p838_p12, %p835_p11 }
  0x40   : > { %843 = shalt.err (!%p840_p13)
}
  0x41   : > { %s844_s26 = scalar_lea.vmem %s207_s25, %s1180_s27  ;;  %s1040_s21 = smov [#allocation2]  }
  0x42   : > { %p845_p0 = scmp.ne.s32.totalorder %s207_s25, %s844_s26  ;;  %s848_s11 = sshll.u32 %s1040_s21, 4  ;;  %s849_s11 = int_to_ptr.vmem [resolvable:$false] %s848_s11 }
  0x43   : > { %s850_s15 = scalar_lea.vmem %s849_s11, 256  ;;  %p851_p5 = scmp.lt.s32.totalorder %s207_s25, %s849_s11 }
  0x44   : > { %p846_p2 = pnand %p845_p0, %p684_p7  ;;  %p852_p8 = scmp.lt.s32.totalorder %s850_s15, %s844_s26 }
  0x46   : > { %p847_p4 = pneg %p846_p2  ;;  %p853_p10 = por %p852_p8, %p851_p5 }
  0x48   : > { %p854_p3 = pnand %p853_p10, %p847_p4 }
  0x4a   : > { %857 = shalt.err (!%p854_p3)
}
  0x4b   : > { %209 = dma.hbm_to_vmem [thread:$0]  (%p684_p7), %s203_s14, %s1180_s27, %s207_s25, %s1183_s8  }
  0x4c PF: > { %212 = sbr.rel (!%p1141_p6) target bundleno = 110 (0x6e), region = 24  ;;  %s213_s4 = sand.u32 (%p1141_p6), 1, %s1018_s17  }
  0x4d   : > { %s689_s29 = sshll.u32 (%p1141_p6), %s1133_s28, 1  ;;  %s688_s9 = sshll.u32 (%p1141_p6), %s213_s4, 1 }
  0x4e   : > { %s222_s7 = ssub.s32 (%p1141_p6), 3, %s689_s29  ;;  %s1211_s24 = scalar_lea.sflag (%p1141_p6), [#allocation6], %s213_s4 }
  0x4f   : > { %p223_p11 = scmp.lt.s32.totalorder (%p1141_p6), %s222_s7, 2  ;;  %s217_s14 = scalar_lea.vmem (%p1141_p6), [#allocation5], %s688_s9 }
  0x51   : > { %s1475_s7 = smov (!%p223_p11, %s222_s7), 2 }
  0x52   : > { %s1208_s23 = sshll.u32 %s1475_s7, 4 }
  0x53   : > { %s227_s6 = ssub.s32 32, %s1208_s23 }
  0x54   : > { %228 = vsyncadd %s1211_s24, %s227_s6  ;;  %s714_s25 = smul.u32 3, %s1030_s20  ;;  %p691_p6 = scmp.ne.s32.totalorder %s1208_s23, 0 }
  0x55   : > { %s235_s28 = sshll.u32 %s217_s14, 4  ;;  %s862_s9 = scalar_lea.hbm %s1426_s1, 96  ;;  %s236_s28 = int_to_ptr.vmem [resolvable:$true] %s235_s28 }
  0x56   : > { %s231_s30 = sadd.s32 %s714_s25, %s689_s29 }
  0x57   : > { %s692_s27 = sshll.u32 %s231_s30, 4 }
  0x58   : > { %s233_s21 = scalar_lea.hbm %s1426_s1, %s692_s27 }
  0x59   : > { %s858_s11 = scalar_lea.hbm %s233_s21, %s1208_s23 }
  0x5a   : > { %p859_p3 = scmp.ne.s32.totalorder %s233_s21, %s858_s11  ;;  %p864_p13 = scmp.lt.s32.totalorder %s862_s9, %s858_s11 }
  0x5c   : > { %p860_p7 = pnand %p859_p3, %p691_p6 }
  0x5e   : > { %p861_p12 = pneg %p860_p7 }
  0x60   : > { %p866_p0 = pnand %p864_p13, %p861_p12 }
  0x62   : > { %869 = shalt.err (!%p866_p0)
}
  0x63   : > { %s870_s29 = scalar_lea.vmem %s236_s28, %s1208_s23  ;;  %s1041_s7 = smov [#allocation5]  }
  0x64   : > { %p871_p2 = scmp.ne.s32.totalorder %s236_s28, %s870_s29  ;;  %s874_s6 = sshll.u32 %s1041_s7, 4  ;;  %s875_s6 = int_to_ptr.vmem [resolvable:$false] %s874_s6 }
  0x65   : > { %s876_s14 = scalar_lea.vmem %s875_s6, 64  ;;  %p877_p8 = scmp.lt.s32.totalorder %s236_s28, %s875_s6 }
  0x66   : > { %p872_p4 = pnand %p871_p2, %p691_p6  ;;  %p878_p10 = scmp.lt.s32.totalorder %s876_s14, %s870_s29 }
  0x68   : > { %p873_p5 = pneg %p872_p4  ;;  %p879_p11 = por %p878_p10, %p877_p8 }
  0x6a   : > { %p880_p3 = pnand %p879_p11, %p873_p5 }
  0x6c   : > { %883 = shalt.err (!%p880_p3)
}
  0x6d   : > { %238 = dma.hbm_to_vmem [thread:$0]  (%p691_p6), %s233_s21, %s1208_s23, %s236_s28, %s1211_s24  }
  0x6e PF: > { %p693_p7 = scmp.ge.s32.totalorder %s1038_s22, 1  ;;  %p240_p12 = scmp.lt.s32.totalorder %s1038_s22, 5 }
  0x70   : > { %p241_p13 = pnand %p693_p7, %p240_p12 }
  0x71   : > { %s246_s25 = sand.u32 (!%p241_p13), 1, %s1014_s16  }
  0x72   : > { %244 = sbr.rel (%p241_p13) target bundleno = 263 (0x107), region = 28  ;;  %s694_s30 = sshll.u32 (!%p241_p13), %s246_s25, 3 }
  0x73   : > { %s247_s27 = scalar_lea.sflag (!%p241_p13), [#allocation3], %s246_s25  ;;  %s250_s8 = scalar_lea.vmem (!%p241_p13), [#allocation2], %s694_s30 }
  0x77   : > { %981 = dma.done.wait (%p1148_p9), %s247_s27, 128  }
  0x78   : > { %983 = vsyncadd (%p1148_p9), %s247_s27, 4294967168  ;;  %s695_s23 = sshll.u32 %s246_s25, 1  ;;  %s256_s24 = scalar_lea.sflag [#allocation6], %s246_s25 }
  0x79   : > { %s259_s28 = scalar_lea.vmem [#allocation5], %s695_s23 }
  0x7a   : > { %985 = dma.done.wait (%p1148_p9), %s256_s24, 32  }
  0x7b   : > { %987 = vsyncadd (%p1148_p9), %s256_s24, 4294967264  ;;  %s1244_s26 = sand.u32 1, %s1002_s13   ;;  %p308_p6 = scmp.eq.s32.totalorder %s1022_s18, 0 }
  0x7c   : > { %s696_s21 = sshll.u32 %s1244_s26, 1  ;;  %v314_v0 = vlaneseq (%p308_p6)  ;;  %v1042_v1 = vmov (%p308_p6), 0.0  }
  0x7d   : > { %s1248_s11 = scalar_lea.vmem [#allocation7], %s696_s21  ;;  %s1250_s15 = scalar_lea.vmem [#allocation8], %s696_s21 }
  0x7e   : > { %313 = sbr.rel (!%p308_p6) target bundleno = 131 (0x83), region = 40  ;;  %vm316_vm0 = vcmp.lt.s32.totalorder (%p308_p6), %v314_v0, 256 }
  0x7f   : > { %318 = vst.msk [vmem:[%s1248_s11] sm:$0x3] (%p308_p6), %vm316_vm0, %v1042_v1  ;;  %319 = vst.msk [vmem:[%s1250_s15] sm:$0x3] (%p308_p6), %vm316_vm0, %v1042_v1 }
  0x83 PF: > { %v1254_v2 = vld [vmem:[%s250_s8] sm:$0xff]  ;;  %v1256_v3 = vld [vmem:[%s259_s28] sm:$0x3]  ;;  %s699_s18 = sshll.u32 %s1026_s19, 8  ;;  %v324_v4 = vlaneseq  ;;  %vm369_vm1 = vcmask 1043456   ;;  %v1043_v9 = vmov 0  }
  0x84   : > { %v327_v5 = vstv %s699_s18  ;;  %vm332_vm2 = vcmp.ge.s32.totalorder %v1256_v3, 0  ;;  %vm333_vm3 = vcmp.ne.s32.totalorder %v1256_v3, 255  ;;  %v1265_v8 = vcombine.high %v1254_v2, %v1254_v2  ;;  %s711_s5 = sshll.u32 %s1026_s19, 5  ;;  %s532_s4 = sshll.u32 %s1250_s15, 4  ;;  %s1314_s4 = int_to_ptr.vmem [resolvable:$true] %s532_s4 }
  0x85   : > { %v325_v6 = vand.u32 127, %v324_v4  ;;  %vm334_vm4 = vmand %vm332_vm2, %vm333_vm3  ;;  %v1261_v7 = vshrl.u32 %v324_v4, 7  ;;  %v384_v11 = vsel %vm369_vm1, %v1254_v2, -inf  ;;  %v1044_v18 = vmov 1966171168   ;;  %s1312_s7 = scalar_lea.hbm %s1428_s3, %s711_s5  ;;  %s504_s6 = scalar_lea.sflag [#allocation9], %s1244_s26 }
  0x86   : > { %v335_v10 = vsel %vm334_vm4, 1, %v1043_v9  ;;  %v385_v16 = vrot.slane %v384_v11, 4  ;;  %v391_v17 = vsel %vm369_vm1, %v1265_v8, -inf  ;;  %v453_v19 = vunpack.c.l.s4 %v1044_v18  ;;  %v473_v43 = vld [vmem:[%s1250_s15] sm:$0x3]  ;;  %s884_s14 = scalar_lea.vmem %s1314_s4, 32 }
  0x87   : > { %v326_v12 = vadd.s32 128, %v325_v6  ;;  %v328_v13 = vadd.s32 %v327_v5, %v325_v6  ;;  %v338_v14 = vsub.s32 0, %v1261_v7  ;;  %v342_v15 = vsub.s32 1, %v1261_v7  ;;  %p885_p9 = scmp.ne.s32.totalorder %s1314_s4, %s884_s14  ;;  %s1046_s25 = smov [#allocation8]  }
  0x88   : > { %v386_v23 = vmax.f32 %v384_v11, %v385_v16  ;;  %v392_v24 = vrot.slane %v391_v17, 4  ;;  %v454_v25 = vunpack.c.0.s8 %v453_v19  ;;  %v1045_v35 = vmov 0.0   ;;  %s888_s30 = sshll.u32 %s1046_s25, 4  ;;  %s889_s30 = int_to_ptr.vmem [resolvable:$false] %s888_s30 }
  0x89   : > { %v329_v20 = vadd.s32 %v327_v5, %v326_v12  ;;  %vm330_vm5 = vcmp.lt.s32.totalorder %v328_v13, 320  ;;  %v339_v21 = vrot.slane %v335_v10, %v338_v14  ;;  %v343_v22 = vrot.slane %v335_v10, %v342_v15  ;;  %p886_p0 = pnand %p885_p9, %p1159_p1  ;;  %s890_s27 = scalar_lea.vmem %s889_s30, 64 }
  0x8a   : > { %v387_v27 = vrot.slane %v386_v23, 2  ;;  %v393_v28 = vmax.f32 %v391_v17, %v392_v24  ;;  %v1286_v32 = vsub.s32 %v454_v25, %v1261_v7  ;;  %vm1303_vm11 = vcmp.lt.s32.totalorder %v324_v4, 256  ;;  %p891_p4 = scmp.lt.s32.totalorder %s1314_s4, %s889_s30  ;;  %p892_p5 = scmp.lt.s32.totalorder %s890_s27, %s884_s14 }
  0x8b   : > { %vm331_vm6 = vcmp.lt.s32.totalorder %v329_v20, 320  ;;  %vm344_vm7 = vcmp.ne.s32.totalorder %v339_v21, 0  ;;  %vm345_vm8 = vcmp.ne.s32.totalorder %v343_v22, 0  ;;  %vm348_vm12 = vcmp.gt.s32.totalorder %v1256_v3, 0  ;;  %p887_p2 = pneg %p886_p0 }
  0x8c   : > { %vm1277_vm9 = vmand %vm330_vm5, %vm344_vm7  ;;  %v388_v30 = vmax.f32 %v386_v23, %v387_v27  ;;  %v394_v31 = vrot.slane %v393_v28, 2  ;;  %p893_p8 = por %p892_p5, %p891_p4 }
  0x8d   : > { %vm1281_vm10 = vmand %vm331_vm6, %vm345_vm8  ;;  %v700_v36 = vsel %vm1277_vm9, 1.0, %v1045_v35 }
  0x8e   : > { %v389_v33 = vrot.slane %v388_v30, 1  ;;  %v395_v34 = vmax.f32 %v393_v28, %v394_v31  ;;  %v701_v37 = vsel %vm1281_vm10, 1.0, %v1045_v35  ;;  %p894_p10 = pnand %p893_p8, %p887_p2 }
  0x8f   : > { %v480_v38 = vcombine.low %v700_v36, %v701_v37 }
  0x90   : > { %v1292_v39 = vmax.f32 %v388_v30, %v389_v33  ;;  %v396_v40 = vrot.slane %v395_v34, 1 }
  0x91   : > { %v487_v41 = vrot.slane %v480_v38, %v1286_v32 }
  0x92   : > { %v1295_v42 = vmax.f32 %v395_v34, %v396_v40 }
  0x93   : > { %v494_v44 = vrot.slane %v487_v41, %v1286_v32 }
  0x94   : > { %v400_v45 = vcombine.low %v1292_v39, %v1295_v42 }
  0x95   : > { %v496_v47 = vadd.f32 %v494_v44, %v473_v43 }
  0x96   : > { %v402_v48 = vsub.f32 %v1254_v2, %v400_v45 }
  0x97   : > { %497 = vst.msk [vmem:[%s1250_s15] sm:$0x3] %vm1303_vm11, %v496_v47 }
  0x98   : > { %v403_v49 = vmul.f32 1.442695, %v402_v48 }
  0x99   : > { %897 = shalt.err (!%p894_p10)
}
  0x9a   : > { %s898_s8 = scalar_lea.hbm %s1312_s7, 32  ;;  %s902_s28 = scalar_lea.hbm %s1428_s3, 64 }
  0x9b   : > { %p899_p11 = scmp.ne.s32.totalorder %s1312_s7, %s898_s8  ;;  %p903_p12 = scmp.lt.s32.totalorder %s1312_s7, %s1428_s3 }
  0x9c   : > { %p904_p13 = scmp.lt.s32.totalorder %s902_s28, %s898_s8 }
  0x9d   : > { %p900_p3 = pnand %p899_p11, %p1159_p1 }
  0x9e   : > { %p905_p6 = por %p904_p13, %p903_p12 }
  0x9f   : > { %p901_p7 = pneg %p900_p3 }
  0xa1   : > { %p906_p9 = pnand %p905_p6, %p901_p7 }
  0xa3   : > { %909 = shalt.err (!%p906_p9)
}
  0xa4   : > { %718 = dma.vmem_to_hbm [thread:$0]  (%p1159_p1), %s1314_s4, 32, %s1312_s7, %s504_s6   ;;  %v349_v50 = vsel %vm348_vm12, %v1256_v3, 0  ;;  %822 = vpow2.f32 %v403_v49 }
  0xa5   : > { %vm350_vm13 = vcmp.lt.s32.totalorder %v349_v50, 3  ;;  %s518_s18 = sshll.u32 %s1248_s11, 4  ;;  %s516_s29 = scalar_lea.hbm %s1427_s2, %s711_s5  ;;  %s519_s18 = int_to_ptr.vmem [resolvable:$true] %s518_s18 }
  0xa6   : > { %v351_v51 = vsel %vm350_vm13, %v349_v50, 3  ;;  %s499_s7 = scalar_lea.sflag [#allocation4], %s1244_s26  ;;  %s910_s6 = scalar_lea.vmem %s519_s18, 32 }
  0xa7   : > { %v357_v52 = vrot.slane %v351_v51, %v338_v14  ;;  %v361_v53 = vrot.slane %v351_v51, %v342_v15  ;;  %p911_p0 = scmp.ne.s32.totalorder %s519_s18, %s910_s6  ;;  %s1047_s14 = smov [#allocation7]  }
  0xa8   : > { %s914_s25 = sshll.u32 %s1047_s14, 4  ;;  %s915_s25 = int_to_ptr.vmem [resolvable:$false] %s914_s25 }
  0xa9   : > { %vm362_vm14 = vcmp.eq.s32.totalorder %v1261_v7, %v357_v52  ;;  %vm363_vm15 = vcmp.eq.s32.totalorder %v1261_v7, %v361_v53  ;;  %p912_p2 = pnand %p911_p0, %p1159_p1  ;;  %s916_s30 = scalar_lea.vmem %s915_s25, 64 }
  0xaa   : > { %v367_v57 = vsel %vm362_vm14, %v1254_v2, 0.0  ;;  %v368_v60 = vsel %vm363_vm15, %v1265_v8, 0.0  ;;  %p917_p5 = scmp.lt.s32.totalorder %s519_s18, %s915_s25  ;;  %p918_p8 = scmp.lt.s32.totalorder %s916_s30, %s910_s6 }
  0xab   : > { %v370_v63 = vsel %vm369_vm1, %v367_v57, 0.0  ;;  %v377_v3 = vsel %vm369_vm1, %v368_v60, 0.0  ;;  %p913_p4 = pneg %p912_p2 }
  0xac   : > { %v371_v4 = vrot.slane %v370_v63, 4  ;;  %v378_v7 = vrot.slane %v377_v3, 4  ;;  %p919_p10 = por %p918_p8, %p917_p5 }
  0xae   : > { %v372_v2 = vadd.f32 %v371_v4, %v370_v63  ;;  %v379_v13 = vadd.f32 %v378_v7, %v377_v3  ;;  %p920_p11 = pnand %p919_p10, %p913_p4 }
  0xb0   : > { %v373_v8 = vrot.slane %v372_v2, 2  ;;  %v380_v15 = vrot.slane %v379_v13, 2 }
  0xb1   : > { %v823_v54 = vpop.eup %822 }
  0xb2   : > { %v406_v55 = vcombine.high %v823_v54, %v823_v54  ;;  %v408_v56 = vsel %vm369_vm1, %v823_v54, 0.0  ;;  %v374_v16 = vadd.f32 %v373_v8, %v372_v2  ;;  %v381_v17 = vadd.f32 %v380_v15, %v379_v13  ;;  %v448_v54 = vld [vmem:[%s1248_s11] sm:$0x3] }
  0xb3   : > { %v409_v58 = vrot.slane %v408_v56, 4 }
  0xb4   : > { %v415_v59 = vsel %vm369_vm1, %v406_v55, 0.0  ;;  %v375_v18 = vrot.slane %v374_v16, 1  ;;  %v382_v19 = vrot.slane %v381_v17, 1 }
  0xb5   : > { %v410_v61 = vadd.f32 %v409_v58, %v408_v56  ;;  %v416_v62 = vrot.slane %v415_v59, 4 }
  0xb6   : > { %v376_v21 = vadd.f32 %v375_v18, %v374_v16  ;;  %v383_v24 = vadd.f32 %v382_v19, %v381_v17 }
  0xb7   : > { %v411_v0 = vrot.slane %v410_v61, 2  ;;  %v417_v1 = vadd.f32 %v416_v62, %v415_v59 }
  0xb9   : > { %v412_v5 = vadd.f32 %v411_v0, %v410_v61  ;;  %v418_v6 = vrot.slane %v417_v1, 2 }
  0xbb   : > { %v413_v9 = vrot.slane %v412_v5, 1  ;;  %v419_v10 = vadd.f32 %v418_v6, %v417_v1 }
  0xbd   : > { %v414_v11 = vadd.f32 %v413_v9, %v412_v5  ;;  %v420_v12 = vrot.slane %v419_v10, 1 }
  0xbf   : > { %v421_v14 = vadd.f32 %v420_v12, %v419_v10  ;;  %824 = vlog2.f32 %v414_v11 }
  0xc1   : > { %826 = vlog2.f32 %v421_v14 }
  0xcc   : > { %v825_v20 = vpop.eup %824 }
  0xcd   : > { %v423_v22 = vmul.f32 0.6931472, %v825_v20 }
  0xce   : > { %v827_v23 = vpop.eup %826 }
  0xcf   : > { %v425_v25 = vmul.f32 0.6931472, %v827_v23  ;;  %v426_v27 = vadd.f32 %v423_v22, %v1292_v39 }
  0xd1   : > { %v427_v28 = vadd.f32 %v425_v25, %v1295_v42  ;;  %v428_v30 = vsub.f32 %v376_v21, %v426_v27 }
  0xd3   : > { %v429_v31 = vsub.f32 %v383_v24, %v427_v28  ;;  %v430_v33 = vmax.f32 %v428_v30, -20.723267 }
  0xd5   : > { %v431_v34 = vmax.f32 %v429_v31, -20.723267  ;;  %v432_v35 = vmin.f32 %v430_v33, -1e-09 }
  0xd7   : > { %v433_v36 = vmin.f32 %v431_v34, -1e-09  ;;  %v434_v37 = vmul.f32 1.442695, %v432_v35 }
  0xd9   : > { %828 = vpow2.f32 %v434_v37  ;;  %v436_v38 = vmul.f32 1.442695, %v433_v36 }
  0xdb   : > { %830 = vpow2.f32 %v436_v38 }
  0xe6   : > { %v829_v40 = vpop.eup %828 }
  0xe7   : > { %v438_v41 = vsub.f32 1.0, %v829_v40 }
  0xe8   : > { %v831_v43 = vpop.eup %830 }
  0xe9   : > { %v439_v44 = vsub.f32 1.0, %v831_v43  ;;  %v440_v39 = vmul.f32 %v438_v41, %v438_v41 }
  0xeb   : > { %v441_v42 = vmul.f32 %v439_v44, %v439_v44  ;;  %v442_v45 = vsub.f32 0.0, %v440_v39 }
  0xed   : > { %v443_v47 = vsub.f32 0.0, %v441_v42  ;;  %v444_v48 = vmul.f32 %v442_v45, %v432_v35 }
  0xef   : > { %v445_v49 = vmul.f32 %v443_v47, %v433_v36  ;;  %v446_v50 = vsel %vm1277_vm9, %v444_v48, 0.0 }
  0xf1   : > { %v447_v51 = vsel %vm1281_vm10, %v445_v49, 0.0 }
  0xf2   : > { %v451_v52 = vcombine.low %v446_v50, %v447_v51 }
  0xf4   : > { %v458_v53 = vrot.slane %v451_v52, %v1286_v32 }
  0xf6   : > { %v465_v55 = vrot.slane %v458_v53, %v1286_v32 }
  0xf8   : > { %v467_v56 = vadd.f32 %v465_v55, %v448_v54 }
  0xfa   : > { %472 = vst.msk [vmem:[%s1248_s11] sm:$0x3] %vm1303_vm11, %v467_v56 }
  0xfb   : > { %923 = shalt.err (!%p920_p11)
}
  0xfc   : > { %s924_s19 = scalar_lea.hbm %s516_s29, 32  ;;  %s928_s5 = scalar_lea.hbm %s1427_s2, 64 }
  0xfd   : > { %p925_p3 = scmp.ne.s32.totalorder %s516_s29, %s924_s19  ;;  %p929_p13 = scmp.lt.s32.totalorder %s516_s29, %s1427_s2 }
  0xfe   : > { %p930_p6 = scmp.lt.s32.totalorder %s928_s5, %s924_s19 }
  0xff   : > { %p926_p7 = pnand %p925_p3, %p1159_p1 }
 0x100   : > { %p931_p9 = por %p930_p6, %p929_p13 }
 0x101   : > { %p927_p12 = pneg %p926_p7 }
 0x103   : > { %p932_p0 = pnand %p931_p9, %p927_p12 }
 0x105   : > { %935 = shalt.err (!%p932_p0)
}
 0x106   : > { %717 = dma.vmem_to_hbm [thread:$0]  (%p1159_p1), %s519_s18, 32, %s516_s29, %s499_s7  }
 0x107 PF: > { %s1451_s23 = sld [smem:[#allocation20_spill]]  ;;  %p728_p2 = scmp.ge.s32.totalorder %s1038_s22, 2 }
 0x108   : > { %s544_s24 = sand.u32 1, %s998_s12  }
 0x109   : > { %s545_s28 = scalar_lea.sflag [#allocation4], %s544_s24 }
 0x10d   : > { %p1452_p4 = scmp.ne.s32.totalorder %s1451_s23, 0 }
 0x10f   : > { %p722_p5 = pnand %p728_p2, %p1452_p4 }
 0x111   : > { %p723_p8 = pneg %p722_p5 }
 0x113   : > { %989 = dma.done.wait (%p723_p8), %s545_s28, 32  }
 0x114   : > { %991 = vsyncadd (%p723_p8), %s545_s28, 4294967264  ;;  %s554_s21 = scalar_lea.sflag [#allocation9], %s544_s24 }
 0x115   : > { %993 = dma.done.wait (%p723_p8), %s554_s21, 32  }
 0x116   : > { %995 = vsyncadd (%p723_p8), %s554_s21, 4294967264  ;;  %s26_s22 = sadd.s32 1, %s1038_s22   ;;  %s1453_s10 = sld [smem:[#allocation14_spill]] }
 0x117   : > { %p23_p10 = scmp.ge.s32.totalorder %s26_s22, 6   ;;  %s1454_s14 = sld [smem:[#allocation18_spill]] }
 0x118   : > { %s1455_s18 = sld [smem:[#allocation19_spill]]  ;;  %s1459_s12 = smov %s1002_s13 }
 0x119   : > { %s1456_s19 = sld [smem:[#allocation15_spill]]  ;;  %s1461_s15 = smov %s1014_s16 }
 0x11a   : > { %s1457_s4 = sld [smem:[#allocation16_spill]]  ;;  %s1462_s16 = smov %s1018_s17 }
 0x11b   : > { %s1458_s21 = sld [smem:[#allocation17_spill]] }
 0x11c   : > { %s1460_s13 = smov %s1453_s10  ;;  %25 = sbr.rel (!%p23_p10) target bundleno = 13 (0xd), region = 107 }
 0x11e   : > { %s1463_s17 = smov %s1455_s18  ;;  %s1464_s18 = smov %s1030_s20 }
 0x120   : > { %s1465_s20 = smov %s1457_s4 }
 0x121   :  { %559 = vsyncpa [#allocation3], 1 }
 0x122   :  { %561 = vsyncpa [#allocation3 + $0x1], 1 }
 0x123   :  { %562 = vsyncpa [#allocation6], 1 }
 0x124   :  { %564 = vsyncpa [#allocation6 + $0x1], 1 }
 0x125   :  { %565 = vsyncpa [#allocation4], 1 }
 0x126   :  { %567 = vsyncpa [#allocation4 + $0x1], 1 }
 0x127   :  { %568 = vsyncpa [#allocation9], 1 }
 0x128   :  { %570 = vsyncpa [#allocation9 + $0x1], 1 }

</bundles_post_ra>
